<compile_context>
chip_gen: v7x
topology: tpu7x:2x2x1
jax: 0.10.0
libtpu: 0.0.40
codegen_flags: <defaults>
</compile_context>

<pallas_src>
import jax
import jax.numpy as jnp
from jax.experimental import pallas as pl
from jax.experimental.pallas import tpu as pltpu


def policy_kernel(x_ref, w1t_ref, b1_ref, w2t_ref, b2_ref, o_ref):
    # x_ref  : (TB, 3)   batch on sublanes, the 3 state features on lanes
    # w1t_ref: (3, 128)  b1_ref: (1, 128)
    # w2t_ref: (128, 3)  b2_ref: (1, 3)
    # o_ref  : (TB, 3)
    x = x_ref[...].astype(jnp.float32)
    w1t = w1t_ref[...]

    # affine1 (K=3): three broadcast multiply-adds on the VPU.  Hidden dim (128)
    # is lane-dense; cheaper than padding K=3 up to 128/256 on the MXU and it
    # overlaps with affine2's MXU work.
    h = (x[:, 0:1] * w1t[0:1, :]
         + x[:, 1:2] * w1t[1:2, :]
         + x[:, 2:3] * w1t[2:3, :]
         + b1_ref[...])

    # Dropout(p=0.6) in eval/inference mode is the identity; ReLU on the VPU.
    h = jnp.maximum(h, 0.0)

    # affine2: dense K=128 contraction on the MXU -> (TB, 3) logits.
    s = jnp.dot(h, w2t_ref[...], preferred_element_type=jnp.float32) + b2_ref[...]

    # Softmax over the 3-wide feature axis: one exp over the full block, one
    # full-block store (no per-row masked writes).
    m = jnp.max(s, axis=-1, keepdims=True)
    e = jnp.exp(s - m)
    inv = pl.reciprocal(jnp.sum(e, axis=-1, keepdims=True), approx=False)
    o_ref[...] = (e * inv).astype(o_ref.dtype)


def _choose_tile(B, tb):
    """Batch-tile rows: big enough to amortize grid-step overhead, small enough
    that moderate batches still give >= 2 grid steps (v7x megacore split)."""
    if B > tb:
        return tb
    return max(8, pl.cdiv(B, 16) * 8)   # ~B/2 rounded up to the 8-sublane granule


def policy_forward(x, w1, b1, w2, b2, *, tb=4096):
    """Forward pass of `Policy` (eval-mode dropout == identity).

    x : (B, 3) float.  Weights in PyTorch (out, in) layout:
        w1 (128, 3), b1 (128,), w2 (3, 128), b2 (3,).
    Returns softmax action probabilities, shape (B, 3), float32.
    """
    B = x.shape[0]
    TB = _choose_tile(B, tb)
    Bp = pl.cdiv(B, TB) * TB

    xp = x.astype(jnp.float32)
    if Bp != B:                       # pad only the ragged tail tile
        xp = jnp.pad(xp, ((0, Bp - B), (0, 0)))

    # Tiny (O(100)-element) weight relayouts into kernel-friendly shapes;
    # negligible next to the streamed batch.
    w1t = w1.T.astype(jnp.float32)               # (3, 128)
    b1r = b1.reshape(1, 128).astype(jnp.float32)
    w2t = w2.T.astype(jnp.float32)               # (128, 3)
    b2r = b2.reshape(1, 3).astype(jnp.float32)

    grid = (Bp // TB,)
    pinned = lambda shp: pl.BlockSpec(shp, lambda i, _s=shp: (0,) * len(_s))

    cost = pl.CostEstimate(
        flops=2 * Bp * 128 * (3 + 3),            # both affine layers
        transcendentals=4 * Bp,                  # exp + reciprocal
        bytes_accessed=4 * (Bp * 3 * 2 + 2 * 128 * 3 + 128 + 3),
    )

    out = pl.pallas_call(
        policy_kernel,
        out_shape=jax.ShapeDtypeStruct((Bp, 3), jnp.float32),
        grid_spec=pltpu.PrefetchScalarGridSpec(
            num_scalar_prefetch=0,
            grid=grid,
            in_specs=[
                pl.BlockSpec((TB, 3), lambda i: (i, 0)),   # streamed x tiles
                pinned((3, 128)),                           # VMEM-resident weights
                pinned((1, 128)),
                pinned((128, 3)),
                pinned((1, 3)),
            ],
            out_specs=pl.BlockSpec((TB, 3), lambda i: (i, 0)),
        ),
        compiler_params=pltpu.CompilerParams(
            dimension_semantics=("parallel",),      # v7x: shard batch over 2 TCs
            vmem_limit_bytes=48 * 1024 * 1024,      # covers lane-padded (TB,3) I/O
        ),                                          # blocks + (TB,128) h on all gens
        cost_estimate=cost,
    )(xp, w1t, b1r, w2t, b2r)

    return out[:B] if Bp != B else out


def init_params(key):
    """Deterministic init mimicking PyTorch nn.Linear defaults
    (uniform(-1/sqrt(fan_in), 1/sqrt(fan_in))), stored in (out, in) layout."""
    k1, k2, k3, k4 = jax.random.split(key, 4)
    bound1 = 1.0 / jnp.sqrt(3.0)
    bound2 = 1.0 / jnp.sqrt(128.0)
    w1 = jax.random.uniform(k1, (128, 3), jnp.float32, -bound1, bound1)
    b1 = jax.random.uniform(k2, (128,), jnp.float32, -bound1, bound1)
    w2 = jax.random.uniform(k3, (3, 128), jnp.float32, -bound2, bound2)
    b2 = jax.random.uniform(k4, (3,), jnp.float32, -bound2, bound2)
    return w1, b1, w2, b2


if __name__ == "__main__":
    key = jax.random.PRNGKey(0)
    kx, kp, kx2 = jax.random.split(key, 3)

    w1, b1, w2, b2 = init_params(kp)

    def reference(x):
        # Plain-JAX reference (eval-mode dropout == identity).
        h = jnp.maximum(x @ w1.T + b1, 0.0)
        logits = h @ w2.T + b2
        return jax.nn.softmax(logits, axis=1)

    # Small batch consistent with the module (state vector has 3 features).
    x = jax.random.normal(kx, (8, 3), jnp.float32)
    probs = jax.block_until_ready(policy_forward(x, w1, b1, w2, b2))
    assert probs.shape == (8, 3)
    assert jnp.allclose(probs, reference(x), atol=5e-3, rtol=5e-3)
    assert jnp.allclose(jnp.sum(probs, axis=1), 1.0, atol=1e-4)

    # Multi-tile path: 2 grid steps + padded ragged tail.
    x2 = jax.random.normal(kx2, (300, 3), jnp.float32)
    probs2 = jax.block_until_ready(policy_forward(x2, w1, b1, w2, b2))
    assert probs2.shape == (300, 3)
    assert jnp.allclose(probs2, reference(x2), atol=5e-3, rtol=5e-3)
    assert jnp.allclose(jnp.sum(probs2, axis=1), 1.0, atol=1e-4)

    print("KERNEL_OK")
</pallas_src>

<mosaic_0001>
module attributes {stable_mosaic.version = 11 : i64} {
  func.func @policy_kernel(%arg0: i32, %arg1: memref<8x3xf32, #tpu.memory_space<vmem>>, %arg2: memref<3x128xf32, #tpu.memory_space<vmem>>, %arg3: memref<1x128xf32, #tpu.memory_space<vmem>>, %arg4: memref<128x3xf32, #tpu.memory_space<vmem>>, %arg5: memref<1x3xf32, #tpu.memory_space<vmem>>, %arg6: memref<8x3xf32, #tpu.memory_space<vmem>>) attributes {dimension_semantics = [#tpu.dimension_semantics<parallel>], iteration_bounds = array<i64: 1>, scalar_prefetch = 0 : i64, scratch_operands = 0 : i64, tpu.core_type = #tpu.core_type<tc>, window_params = [{transform_indices = @transform_0, window_bounds = array<i64: 8, 3>}, {pipeline_mode = #tpu.pipeline_mode<synchronous>, transform_indices = @transform_1, window_bounds = array<i64: 3, 128>}, {pipeline_mode = #tpu.pipeline_mode<synchronous>, transform_indices = @transform_2, window_bounds = array<i64: 1, 128>}, {pipeline_mode = #tpu.pipeline_mode<synchronous>, transform_indices = @transform_3, window_bounds = array<i64: 128, 3>}, {pipeline_mode = #tpu.pipeline_mode<synchronous>, transform_indices = @transform_4, window_bounds = array<i64: 1, 3>}, {transform_indices = @transform_5, window_bounds = array<i64: 8, 3>}]} {
    %c0 = arith.constant 0 : index
    %c0_0 = arith.constant 0 : index
    %0 = vector.load %arg1[%c0, %c0_0] : memref<8x3xf32, #tpu.memory_space<vmem>>, vector<8x3xf32>
    %c0_1 = arith.constant 0 : index
    %c0_2 = arith.constant 0 : index
    %1 = vector.load %arg2[%c0_1, %c0_2] : memref<3x128xf32, #tpu.memory_space<vmem>>, vector<3x128xf32>
    %2 = vector.extract_strided_slice %0 {offsets = [0, 0], sizes = [8, 1], strides = [1, 1]} : vector<8x3xf32> to vector<8x1xf32>
    %3 = vector.extract_strided_slice %1 {offsets = [0, 0], sizes = [1, 128], strides = [1, 1]} : vector<3x128xf32> to vector<1x128xf32>
    %4 = vector.broadcast %2 : vector<8x1xf32> to vector<8x128xf32>
    %5 = vector.broadcast %3 : vector<1x128xf32> to vector<8x128xf32>
    %6 = arith.mulf %4, %5 : vector<8x128xf32>
    %7 = vector.extract_strided_slice %0 {offsets = [0, 1], sizes = [8, 1], strides = [1, 1]} : vector<8x3xf32> to vector<8x1xf32>
    %8 = vector.extract_strided_slice %1 {offsets = [1, 0], sizes = [1, 128], strides = [1, 1]} : vector<3x128xf32> to vector<1x128xf32>
    %9 = vector.broadcast %7 : vector<8x1xf32> to vector<8x128xf32>
    %10 = vector.broadcast %8 : vector<1x128xf32> to vector<8x128xf32>
    %11 = arith.mulf %9, %10 : vector<8x128xf32>
    %12 = arith.addf %6, %11 : vector<8x128xf32>
    %13 = vector.extract_strided_slice %0 {offsets = [0, 2], sizes = [8, 1], strides = [1, 1]} : vector<8x3xf32> to vector<8x1xf32>
    %14 = vector.extract_strided_slice %1 {offsets = [2, 0], sizes = [1, 128], strides = [1, 1]} : vector<3x128xf32> to vector<1x128xf32>
    %15 = vector.broadcast %13 : vector<8x1xf32> to vector<8x128xf32>
    %16 = vector.broadcast %14 : vector<1x128xf32> to vector<8x128xf32>
    %17 = arith.mulf %15, %16 : vector<8x128xf32>
    %18 = arith.addf %12, %17 : vector<8x128xf32>
    %c0_3 = arith.constant 0 : index
    %c0_4 = arith.constant 0 : index
    %19 = vector.load %arg3[%c0_3, %c0_4] : memref<1x128xf32, #tpu.memory_space<vmem>>, vector<1x128xf32>
    %20 = vector.broadcast %19 : vector<1x128xf32> to vector<8x128xf32>
    %21 = arith.addf %18, %20 : vector<8x128xf32>
    %cst = arith.constant 0.000000e+00 : f32
    %22 = vector.broadcast %cst : f32 to vector<8x128xf32>
    %23 = arith.maximumf %21, %22 : vector<8x128xf32>
    %c0_5 = arith.constant 0 : index
    %c0_6 = arith.constant 0 : index
    %24 = vector.load %arg4[%c0_5, %c0_6] : memref<128x3xf32, #tpu.memory_space<vmem>>, vector<128x3xf32>
    %cst_7 = arith.constant dense<0.000000e+00> : vector<8x3xf32>
    %25 = tpu.matmul %23, %24, %cst_7 {dimension_numbers = #tpu.dot_dimension_numbers<[1], [0], [0], [1], [0, 0, 1, 1], [], []>} : vector<8x128xf32>, vector<128x3xf32>, vector<8x3xf32> -> vector<8x3xf32>
    %c0_8 = arith.constant 0 : index
    %c0_9 = arith.constant 0 : index
    %26 = vector.load %arg5[%c0_8, %c0_9] : memref<1x3xf32, #tpu.memory_space<vmem>>, vector<1x3xf32>
    %27 = vector.broadcast %26 : vector<1x3xf32> to vector<8x3xf32>
    %28 = arith.addf %25, %27 : vector<8x3xf32>
    %cst_10 = arith.constant dense<0xFF800000> : vector<8xf32>
    %29 = vector.multi_reduction <maximumf>, %28, %cst_10 [1] : vector<8x3xf32> to vector<8xf32>
    %30 = vector.shape_cast %29 : vector<8xf32> to vector<8x1xf32>
    %31 = vector.broadcast %30 : vector<8x1xf32> to vector<8x3xf32>
    %32 = arith.subf %28, %31 : vector<8x3xf32>
    %33 = math.exp %32 : vector<8x3xf32>
    %cst_11 = arith.constant dense<0.000000e+00> : vector<8xf32>
    %34 = vector.multi_reduction <add>, %33, %cst_11 [1] : vector<8x3xf32> to vector<8xf32>
    %35 = vector.shape_cast %34 : vector<8xf32> to vector<8x1xf32>
    %36 = tpu.reciprocal %35 : vector<8x1xf32> -> vector<8x1xf32>
    %37 = vector.broadcast %36 : vector<8x1xf32> to vector<8x3xf32>
    %38 = arith.mulf %33, %37 : vector<8x3xf32>
    %c0_12 = arith.constant 0 : index
    %c0_13 = arith.constant 0 : index
    %39 = vector.load %arg6[%c0_12, %c0_13] : memref<8x3xf32, #tpu.memory_space<vmem>>, vector<8x3xf32>
    tpu.vector_store %arg6[%c0_12, %c0_13], %38 {strides = array<i32>} : memref<8x3xf32, #tpu.memory_space<vmem>>, vector<8x3xf32>,
    return
  }
  func.func @transform_0(%arg0: i32) -> (i32, i32) {
    %c0_i32 = arith.constant 0 : i32
    %c0_i32_0 = arith.constant 0 : i32
    return %arg0, %c0_i32 : i32, i32
  }
  func.func @transform_1(%arg0: i32) -> (i32, i32) {
    %c0_i32 = arith.constant 0 : i32
    %c0_i32_0 = arith.constant 0 : i32
    %c0_i32_1 = arith.constant 0 : i32
    return %c0_i32, %c0_i32_0 : i32, i32
  }
  func.func @transform_2(%arg0: i32) -> (i32, i32) {
    %c0_i32 = arith.constant 0 : i32
    %c0_i32_0 = arith.constant 0 : i32
    %c0_i32_1 = arith.constant 0 : i32
    return %c0_i32, %c0_i32_0 : i32, i32
  }
  func.func @transform_3(%arg0: i32) -> (i32, i32) {
    %c0_i32 = arith.constant 0 : i32
    %c0_i32_0 = arith.constant 0 : i32
    %c0_i32_1 = arith.constant 0 : i32
    return %c0_i32, %c0_i32_0 : i32, i32
  }
  func.func @transform_4(%arg0: i32) -> (i32, i32) {
    %c0_i32 = arith.constant 0 : i32
    %c0_i32_0 = arith.constant 0 : i32
    %c0_i32_1 = arith.constant 0 : i32
    return %c0_i32, %c0_i32_0 : i32, i32
  }
  func.func @transform_5(%arg0: i32) -> (i32, i32) {
    %c0_i32 = arith.constant 0 : i32
    %c0_i32_0 = arith.constant 0 : i32
    return %arg0, %c0_i32 : i32, i32
  }
}

</mosaic_0001>

<bundles_post_ra>
// kernel: tpu_custom_call.1
= control target key start
LH: loop header
LB: loop body
LE: loop exit
PB: predicated region body
PF: predicated region fallthrough
CT: control target
= control target key end

     0   :  { %v263_v0 = vmov 0   ;;  %v264_v2 = vmov 2   ;;  %v265_v8 = vmov 0.0|0.0   ;;  %v266_v12 = vmov 1   ;;  %s365_s0 = inlined_call_operand.vmem [shape: f32[8,3], index: 0, kind: input, shape index: {}]   ;;  %s366_s3 = inlined_call_operand.vmem [shape: f32[128,3], index: 3, kind: input, shape index: {}]   ;;  %s367_s1 = inlined_call_operand.vmem [shape: f32[3,128], index: 1, kind: input, shape index: {}]   ;;  %s368_s2 = inlined_call_operand.vmem [shape: f32[1,128], index: 2, kind: input, shape index: {}]   ;;  %s369_s4 = inlined_call_operand.vmem [shape: f32[1,3], index: 4, kind: input, shape index: {}]   ;;  %s370_s5 = inlined_call_operand.vmem [shape: f32[8,3], index: 5, kind: output, shape index: {}]  }
   0x1   :  { %255 = vset.pattern.permute.xlu0 %v263_v0  ;;  %v20_v1 = vld [vmem:[%s365_s0] sm:$0xff]  ;;  %257 = vset.pattern.permute.xlu1 %v264_v2  ;;  %v62_v4 = vld [vmem:[%s366_s3 + $0x8] sm:$0xff]  ;;  %v63_v6 = vld [vmem:[%s366_s3 + $0x10] sm:$0xff]  ;;  %vm267_vm0 = vmmov 0   ;;  %v268_v17 = vmov 0.0   ;;  %v27_v30 = vlaneseq  ;;  %vm154_vm1 = vcmask 23552  }
   0x2   :  { %v61_v3 = vld [vmem:[%s366_s3] sm:$0xff]  ;;  %24 = vperm.xlu0 %255, %v20_v1   ;;  %43 = vperm.xlu1 %257, %v20_v1   ;;  %v64_v7 = vld [vmem:[%s366_s3 + $0x18] sm:$0xff]  ;;  %v66_v11 = vld [vmem:[%s366_s3 + $0x28] sm:$0xff] }
   0x3   :  { %v226_v5 = vpack.c.bf16 %v62_v4, %v61_v3  ;;  %225 = vmatprep.subr.bf16.mxu0 %v265_v8  ;;  %v229_v9 = vpack.c.bf16 %v64_v7, %v63_v6  ;;  %v65_v10 = vld [vmem:[%s366_s3 + $0x20] sm:$0xff]  ;;  %v67_v14 = vld [vmem:[%s366_s3 + $0x30] sm:$0xff]  ;;  %v68_v15 = vld [vmem:[%s366_s3 + $0x38] sm:$0xff]  ;;  %222 = vmatprep.mubr.msk.f32.mxu0 %vm267_vm0, %v268_v17  ;;  %v28_v31 = vshrl.u32 %v27_v30, 7 }
   0x4   :  { %v232_v13 = vpack.c.bf16 %v66_v11, %v65_v10  ;;  %v235_v16 = vpack.c.bf16 %v68_v15, %v67_v14  ;;  %v69_v18 = vld [vmem:[%s366_s3 + $0x40] sm:$0xff]  ;;  %v70_v19 = vld [vmem:[%s366_s3 + $0x48] sm:$0xff]  ;;  %v71_v21 = vld [vmem:[%s366_s3 + $0x50] sm:$0xff] }
   0x5   :  { %227 = vmatpush3.bf16.msra.mxu0 %v226_v5  ;;  %v238_v20 = vpack.c.bf16 %v70_v19, %v69_v18  ;;  %v72_v22 = vld [vmem:[%s366_s3 + $0x58] sm:$0xff]  ;;  %v73_v24 = vld [vmem:[%s366_s3 + $0x60] sm:$0xff]  ;;  %v74_v25 = vld [vmem:[%s366_s3 + $0x68] sm:$0xff]  ;;  %v29_v32 = vsub.s32 0, %v28_v31  ;;  %v38_v33 = vsub.s32 1, %v28_v31  ;;  %v48_v34 = vsub.s32 2, %v28_v31 }
   0x6   :  { %228 = vmatprep.subr.bf16.mxu0 %v265_v8  ;;  %256 = vset.pattern.permute.xlu0 %v266_v12  ;;  %v241_v23 = vpack.c.bf16 %v72_v22, %v71_v21  ;;  %v244_v26 = vpack.c.bf16 %v74_v25, %v73_v24  ;;  %v75_v27 = vld [vmem:[%s366_s3 + $0x70] sm:$0xff]  ;;  %v76_v28 = vld [vmem:[%s366_s3 + $0x78] sm:$0xff]  ;;  %v21_v35 = vld [vmem:[%s367_s1] sm:$0x7] }
   0x7   :  { %33 = vperm.xlu0 %256, %v20_v1   ;;  %v247_v29 = vpack.c.bf16 %v76_v28, %v75_v27  ;;  %v30_v37 = vrot.slane %v21_v35, %v29_v32  ;;  %v39_v38 = vrot.slane %v21_v35, %v38_v33  ;;  %v49_v39 = vrot.slane %v21_v35, %v48_v34  ;;  %v171_v46 = vld [vmem:[%s368_s2] ss:$0 sm:$0xff] }
   0x8   :  { %v172_v50 = vld [vmem:[%s369_s4] ss:$0 sm:$0xff] }
   0x9   :  { %230 = vmatpush3.bf16.msra.mxu0 %v229_v9 }
   0xa   :  { %231 = vmatprep.subr.bf16.mxu0 %v265_v8 }
   0xb   :  { %258 = vset.pattern.permute.xlu0 %v264_v2 }
   0xd   :  { %233 = vmatpush3.bf16.msra.mxu0 %v232_v13 }
   0xe   :  { %234 = vmatprep.subr.bf16.mxu0 %v265_v8 }
  0x11   :  { %236 = vmatpush3.bf16.msra.mxu0 %v235_v16 }
  0x12   :  { %237 = vmatprep.subr.bf16.mxu0 %v265_v8 }
  0x15   :  { %239 = vmatpush3.bf16.msra.mxu0 %v238_v20 }
  0x16   :  { %240 = vmatprep.subr.bf16.mxu0 %v265_v8 }
  0x19   :  { %242 = vmatpush3.bf16.msra.mxu0 %v241_v23 }
  0x1a   :  { %243 = vmatprep.subr.bf16.mxu0 %v265_v8 }
  0x1d   :  { %245 = vmatpush3.bf16.msra.mxu0 %v244_v26 }
  0x1e   :  { %246 = vmatprep.subr.bf16.mxu0 %v265_v8 }
  0x21   :  { %248 = vmatpush3.bf16.msra.mxu0 %v247_v29 }
  0x81   :  { %v25_v36 = vpop.permute.xlu0 %24  ;;  %v44_v40 = vpop.permute.xlu1 %43 }
  0x82   :  { %v31_v42 = vmul.f32 %v30_v37, %v25_v36  ;;  %v50_v44 = vmul.f32 %v49_v39, %v44_v40 }
  0x86   :  { %v34_v41 = vpop.permute.xlu0 %33 }
  0x87   :  { %v40_v43 = vmul.f32 %v39_v38, %v34_v41 }
  0x89   :  { %v41_v45 = vadd.f32 %v40_v43, %v31_v42 }
  0x8b   :  { %v51_v47 = vadd.f32 %v50_v44, %v41_v45 }
  0x8d   :  { %v59_v48 = vadd.f32 %v171_v46, %v51_v47 }
  0x8f   :  { %v60_v49 = vmax.f32 %v59_v48, 0.0 }
  0x91   :  { %223 = vmatmul.mubr.f32.vlgmr.msra.gmra.mrb[0].mxu0 %v60_v49 }
 0x164   :  { %v150_v51 = vpop.f32.mrb[0].mxu0 }
 0x165   :  { %v151_v52 = vadd.f32 %v172_v50, %v150_v51  ;;  %v224_v53 = vpop.f32.mrb[1].mxu0 }
 0x167   :  { %v155_v54 = vsel %vm154_vm1, %v151_v52, -inf }
 0x168   :  { %156 = vmax.xlane.f32.xlu1 %v155_v54 }
 0x1f5   :  { %v157_v55 = vpop.xlane.xlu1 %156 }
 0x1f6   :  { %v158_v56 = vsub.f32 %v151_v52, %v157_v55 }
 0x1f8   :  { %v159_v57 = vmul.f32 1.442695, %v158_v56 }
 0x1fa   :  { %259 = vpow2.f32 %v159_v57 }
 0x204   :  { %v260_v58 = vpop.eup %259 }
 0x205   :  { %v161_v59 = vsel %vm154_vm1, %v260_v58, 0.0 }
 0x206   :  { %162 = vadd.xlane.f32.xlu0 %v161_v59 }
 0x293   :  { %v163_v60 = vpop.xlane.xlu0 %162 }
 0x294   :  { %261 = vrcp.f32 %v163_v60 }
 0x29e   :  { %v262_v61 = vpop.eup %261 }
 0x29f   :  { %v165_v62 = vmul.f32 %v262_v61, %v260_v58 }
 0x2a1   :  { %166 = vst.msk [vmem:[%s370_s5] sm:$0xff] %vm154_vm1, %v165_v62 }

</bundles_post_ra>
